<compile_context>
chip_gen: v5e
topology: v5e:2x2
jax: 0.10.0
libtpu: 0.0.40
codegen_flags: <defaults>
</compile_context>

<pallas_src>
import jax
import jax.numpy as jnp
from jax.experimental import pallas as pl
from jax.experimental.pallas import tpu as pltpu


def fpn_block_kernel(x_ref, skip_ref, w_ref, b_ref, o_ref):
    # x_ref   : (TR, 2W, Cp)     width-doubled low-res rows (reused for a=0,1)
    # skip_ref: (TR, 1, 2W, Cs)  skip rows for this (row tile, slot a)
    # w_ref   : (Cs, Cp)         1x1 conv weight (transposed)
    # b_ref   : (1, Cp)          1x1 conv bias
    # o_ref   : (TR, 1, 2W, Cp)
    tr, _, w2, cs = skip_ref.shape
    cp = o_ref.shape[-1]

    s = skip_ref[...].reshape(tr * w2, cs)                     # pixels x Cs
    conv = jnp.dot(s, w_ref[...], preferred_element_type=jnp.float32)
    conv = conv + b_ref[...].astype(jnp.float32)
    x = x_ref[...].reshape(tr * w2, cp).astype(jnp.float32)
    o_ref[...] = (conv + x).astype(o_ref.dtype).reshape(tr, 1, w2, cp)


def _largest_divisor_leq(n, cap):
    cap = max(1, min(n, cap))
    for d in range(cap, 0, -1):
        if n % d == 0:
            return d
    return 1


def fpn_block_forward(x_nchw, skip_nchw, weight, bias, *, target_pixels=2048):
    """FPNBlock.forward: nearest-2x upsample of x + 1x1 conv of skip (NCHW in/out)."""
    N, Cp, H, W = x_nchw.shape
    _, Cs, Hs, Ws = skip_nchw.shape
    assert Hs == 2 * H and Ws == 2 * W
    R = N * H          # low-res rows
    W2 = 2 * W         # output width

    # ---- glue (plain JAX; fuses with the unavoidable NCHW<->NHWC copies) ----
    x_nhwc = jnp.transpose(x_nchw, (0, 2, 3, 1))                       # (N,H,W,Cp)
    x_w = jnp.repeat(x_nhwc, 2, axis=2).reshape(R, W2, Cp)             # (R,2W,Cp)
    skip_r = jnp.transpose(skip_nchw, (0, 2, 3, 1)).reshape(R, 2, W2, Cs)
    wt = weight.reshape(Cp, Cs).T                                      # (Cs, Cp)
    b = bias.reshape(1, Cp)

    # ---- tiling: TR low-res rows per grid step; slot axis innermost ----
    tr = _largest_divisor_leq(R, max(1, target_pixels // W2))
    grid = (R // tr, 2)

    itemsize = jnp.dtype(x_nchw.dtype).itemsize
    blk_bytes = tr * W2 * (2 * Cp + Cs) * itemsize + (Cs + 1) * Cp * itemsize
    vmem_limit = int(min(100 * 2**20, max(24 * 2**20, 4 * blk_bytes)))

    out_r = pl.pallas_call(
        fpn_block_kernel,
        out_shape=jax.ShapeDtypeStruct((R, 2, W2, Cp), x_nchw.dtype),
        grid_spec=pltpu.PrefetchScalarGridSpec(
            num_scalar_prefetch=0,
            grid=grid,
            in_specs=[
                # x: same block for a=0 and a=1 -> DMA'd once per row tile.
                pl.BlockSpec((tr, W2, Cp), lambda r, a: (r, 0, 0)),
                pl.BlockSpec((tr, 1, W2, Cs), lambda r, a: (r, a, 0, 0)),
                pl.BlockSpec((Cs, Cp), lambda r, a: (0, 0)),
                pl.BlockSpec((1, Cp), lambda r, a: (0, 0)),
            ],
            out_specs=pl.BlockSpec((tr, 1, W2, Cp), lambda r, a: (r, a, 0, 0)),
        ),
        compiler_params=pltpu.CompilerParams(
            dimension_semantics=("parallel", "arbitrary"),
            vmem_limit_bytes=vmem_limit),
    )(x_w, skip_r, wt, b)

    # ---- free reshape back to NHWC, then NCHW ----
    out_nhwc = out_r.reshape(N, 2 * H, W2, Cp)
    return jnp.transpose(out_nhwc, (0, 3, 1, 2))


def fpn_block_reference(x_nchw, skip_nchw, weight, bias):
    """Pure-JAX reference matching the PyTorch module."""
    Cp, Cs = weight.shape[0], weight.shape[1]
    x_up = jnp.repeat(jnp.repeat(x_nchw, 2, axis=2), 2, axis=3)
    conv = jnp.einsum('nchw,oc->nohw', skip_nchw, weight.reshape(Cp, Cs))
    conv = conv + bias[None, :, None, None]
    return x_up + conv


if __name__ == "__main__":
    key = jax.random.PRNGKey(0)
    N, Cp, Cs, H, W = 2, 8, 4, 8, 8   # pyramid_channels=8, skip_channels=4
    k1, k2, k3, k4 = jax.random.split(key, 4)

    x = jax.random.normal(k1, (N, Cp, H, W), jnp.float32)             # pyramid feature
    skip = jax.random.normal(k2, (N, Cs, 2 * H, 2 * W), jnp.float32)  # skip feature

    # Conv2d(skip_channels, pyramid_channels, kernel_size=1) parameters
    weight = jax.random.normal(k3, (Cp, Cs, 1, 1), jnp.float32) * 0.1
    bias = jax.random.normal(k4, (Cp,), jnp.float32) * 0.1

    out = jax.block_until_ready(fpn_block_forward(x, skip, weight, bias))

    ref = fpn_block_reference(x, skip, weight, bias)
    assert out.shape == (N, Cp, 2 * H, 2 * W)
    assert jnp.allclose(out, ref, atol=1e-5, rtol=1e-5), "mismatch vs reference"
    print("KERNEL_OK")
</pallas_src>

<mosaic_0001>
module attributes {stable_mosaic.version = 11 : i64} {
  func.func @fpn_block_kernel(%arg0: i32, %arg1: i32, %arg2: memref<16x16x8xf32, #tpu.memory_space<vmem>>, %arg3: memref<16x1x16x4xf32, #tpu.memory_space<vmem>>, %arg4: memref<4x8xf32, #tpu.memory_space<vmem>>, %arg5: memref<1x8xf32, #tpu.memory_space<vmem>>, %arg6: memref<16x1x16x8xf32, #tpu.memory_space<vmem>>) attributes {dimension_semantics = [#tpu.dimension_semantics<parallel>, #tpu.dimension_semantics<arbitrary>], iteration_bounds = array<i64: 1, 2>, scalar_prefetch = 0 : i64, scratch_operands = 0 : i64, tpu.core_type = #tpu.core_type<tc>, window_params = [{transform_indices = @transform_0, window_bounds = array<i64: 16, 16, 8>}, {transform_indices = @transform_1, window_bounds = array<i64: 16, 1, 16, 4>}, {pipeline_mode = #tpu.pipeline_mode<synchronous>, transform_indices = @transform_2, window_bounds = array<i64: 4, 8>}, {pipeline_mode = #tpu.pipeline_mode<synchronous>, transform_indices = @transform_3, window_bounds = array<i64: 1, 8>}, {transform_indices = @transform_4, window_bounds = array<i64: 16, 1, 16, 8>}]} {
    %c0 = arith.constant 0 : index
    %c0_0 = arith.constant 0 : index
    %c0_1 = arith.constant 0 : index
    %c0_2 = arith.constant 0 : index
    %0 = vector.load %arg3[%c0, %c0_0, %c0_1, %c0_2] : memref<16x1x16x4xf32, #tpu.memory_space<vmem>>, vector<16x1x16x4xf32>
    %1 = vector.shape_cast %0 : vector<16x1x16x4xf32> to vector<256x4xf32>
    %c0_3 = arith.constant 0 : index
    %c0_4 = arith.constant 0 : index
    %2 = vector.load %arg4[%c0_3, %c0_4] : memref<4x8xf32, #tpu.memory_space<vmem>>, vector<4x8xf32>
    %cst = arith.constant dense<0.000000e+00> : vector<256x8xf32>
    %3 = tpu.matmul %1, %2, %cst {dimension_numbers = #tpu.dot_dimension_numbers<[1], [0], [0], [1], [0, 0, 1, 1], [], []>} : vector<256x4xf32>, vector<4x8xf32>, vector<256x8xf32> -> vector<256x8xf32>
    %c0_5 = arith.constant 0 : index
    %c0_6 = arith.constant 0 : index
    %4 = vector.load %arg5[%c0_5, %c0_6] : memref<1x8xf32, #tpu.memory_space<vmem>>, vector<1x8xf32>
    %5 = vector.broadcast %4 : vector<1x8xf32> to vector<256x8xf32>
    %6 = arith.addf %3, %5 : vector<256x8xf32>
    %c0_7 = arith.constant 0 : index
    %c0_8 = arith.constant 0 : index
    %c0_9 = arith.constant 0 : index
    %7 = vector.load %arg2[%c0_7, %c0_8, %c0_9] : memref<16x16x8xf32, #tpu.memory_space<vmem>>, vector<16x16x8xf32>
    %8 = vector.shape_cast %7 : vector<16x16x8xf32> to vector<256x8xf32>
    %9 = arith.addf %6, %8 : vector<256x8xf32>
    %10 = vector.shape_cast %9 : vector<256x8xf32> to vector<16x1x16x8xf32>
    %c0_10 = arith.constant 0 : index
    %c0_11 = arith.constant 0 : index
    %c0_12 = arith.constant 0 : index
    %c0_13 = arith.constant 0 : index
    %11 = vector.load %arg6[%c0_10, %c0_11, %c0_12, %c0_13] : memref<16x1x16x8xf32, #tpu.memory_space<vmem>>, vector<16x1x16x8xf32>
    tpu.vector_store %arg6[%c0_10, %c0_11, %c0_12, %c0_13], %10 {strides = array<i32>} : memref<16x1x16x8xf32, #tpu.memory_space<vmem>>, vector<16x1x16x8xf32>,
    return
  }
  func.func @transform_0(%arg0: i32, %arg1: i32) -> (i32, i32, i32) {
    %c0_i32 = arith.constant 0 : i32
    %c0_i32_0 = arith.constant 0 : i32
    %c0_i32_1 = arith.constant 0 : i32
    return %arg0, %c0_i32, %c0_i32_0 : i32, i32, i32
  }
  func.func @transform_1(%arg0: i32, %arg1: i32) -> (i32, i32, i32, i32) {
    %c0_i32 = arith.constant 0 : i32
    %c0_i32_0 = arith.constant 0 : i32
    %c0_i32_1 = arith.constant 0 : i32
    return %arg0, %arg1, %c0_i32, %c0_i32_0 : i32, i32, i32, i32
  }
  func.func @transform_2(%arg0: i32, %arg1: i32) -> (i32, i32) {
    %c0_i32 = arith.constant 0 : i32
    %c0_i32_0 = arith.constant 0 : i32
    %c0_i32_1 = arith.constant 0 : i32
    return %c0_i32, %c0_i32_0 : i32, i32
  }
  func.func @transform_3(%arg0: i32, %arg1: i32) -> (i32, i32) {
    %c0_i32 = arith.constant 0 : i32
    %c0_i32_0 = arith.constant 0 : i32
    %c0_i32_1 = arith.constant 0 : i32
    return %c0_i32, %c0_i32_0 : i32, i32
  }
  func.func @transform_4(%arg0: i32, %arg1: i32) -> (i32, i32, i32, i32) {
    %c0_i32 = arith.constant 0 : i32
    %c0_i32_0 = arith.constant 0 : i32
    %c0_i32_1 = arith.constant 0 : i32
    return %arg0, %arg1, %c0_i32, %c0_i32_0 : i32, i32, i32, i32
  }
}

</mosaic_0001>

<bundles_post_ra>
// kernel: tpu_custom_call.1
= control target key start
LH: loop header
LB: loop body
LE: loop exit
PB: predicated region body
PF: predicated region fallthrough
CT: control target
= control target key end

     0   :  { %s1162_s15 = smov 0   ;;  %s1164_s16 = smov 0   ;;  %s1640_s0 = inlined_call_operand.vmem [shape: f32[16,16,8], index: 0, kind: input, shape index: {}]   ;;  %s1641_s1 = inlined_call_operand.vmem [shape: f32[16,2,16,4], index: 1, kind: input, shape index: {}]   ;;  %s1642_s2 = inlined_call_operand.vmem [shape: f32[4,8], index: 2, kind: input, shape index: {}]   ;;  %s1643_s3 = inlined_call_operand.vmem [shape: f32[1,8], index: 3, kind: input, shape index: {}]   ;;  %s1644_s4 = inlined_call_operand.vmem [shape: f32[16,2,16,8], index: 4, kind: output, shape index: {}]  }
   0x1   :  { %s1166_s17 = smov 0   ;;  %s1168_s18 = smov 0  }
   0x2   :  { %s1170_s19 = smov 0  }
   0x3 LB: > { %s23_s20 = sadd.s32 1, %s1131_s18  ;;  %s1002_s21 = sadd.s32 4294967295, %s1135_s19   ;;  %s1135_s19 = sphi %s1170_s19, %s14_s19   ;;  %s1131_s18 = sphi %s1168_s18, %s1649_s18   ;;  %s1127_s17 = sphi %s1166_s17, %s1648_s17   ;;  %s1123_s16 = sphi %s1164_s16, %s1647_s16   ;;  %s1119_s15 = sphi %s1162_s15, %s1646_s15  }
   0x4   : > { %p24_p0 = scmp.ge.s32.totalorder %s23_s20, 2  ;;  %p68_p1 = scmp.ne.s32.totalorder %s1123_s16, %s1119_s15 }
   0x5   : > { %p69_p2 = scmp.eq.s32.totalorder %s1135_s19, 0  ;;  %p142_p4 = scmp.eq.s32.totalorder %s1002_s21, 1 }
   0x6   : > { %s1651_s20 = smov (%p24_p0, %s23_s20), 0  ;;  %s61_s23 = sadd.s32 1, %s1123_s16 }
   0x7   : > { %p70_p3 = por %p69_p2, %p68_p1  ;;  %s57_s22 = ssub.s32 %s1131_s18, %s1651_s20 }
   0x8   : > { %p59_p5 = scmp.eq.s32.totalorder %s57_s22, 0  ;;  %p1197_p6 = por %p142_p4, %p68_p1 }
   0x9   : > { %p1006_p7 = scmp.ge.s32.totalorder %s1135_s19, 2 }
   0xa   : > { %s1202_s25 = scalar_select %p59_p5, %s1123_s16, %s61_s23  }
   0xb   : > { %180 = sbr.rel (%p1006_p7) target bundleno = 52 (0x34), region = 28 }
  0x10   : > { %183 = sbr.rel (!%p70_p3) target bundleno = 52 (0x34), region = 32  ;;  %s185_s26 = sand.u32 (%p70_p3), 1, %s1123_s16  }
  0x11   : > { %s1051_s27 = sshll.u32 (%p70_p3), %s1131_s18, 4  ;;  %s1007_s28 = sshll.u32 (%p70_p3), %s185_s26, 8 }
  0x12   : > { %s1210_s5 = scalar_lea.vmem (%p70_p3), %s1641_s1, %s1051_s27  ;;  %s1215_s6 = scalar_lea.vmem (%p70_p3), [#allocation2], %s1007_s28 }
  0x13   : > { %v284_v0 = vld [vmem:[%s1210_s5] sm:$0xff] (%p70_p3)  ;;  %v286_v1 = vld [vmem:[%s1210_s5 + $0x8] sm:$0xff] (%p70_p3) }
  0x14   : > { %v288_v2 = vld [vmem:[%s1210_s5 + $0x20] sm:$0xff] (%p70_p3)  ;;  %285 = vst [vmem:[%s1215_s6] sm:$0xff] (%p70_p3), %v284_v0  ;;  %v290_v3 = vld [vmem:[%s1210_s5 + $0x28] sm:$0xff] (%p70_p3) }
  0x15   : > { %287 = vst [vmem:[%s1215_s6 + $0x8] sm:$0xff] %v286_v1  ;;  %v292_v4 = vld [vmem:[%s1210_s5 + $0x40] sm:$0xff]  ;;  %v294_v5 = vld [vmem:[%s1210_s5 + $0x48] sm:$0xff] }
  0x16   : > { %289 = vst [vmem:[%s1215_s6 + $0x10] sm:$0xff] %v288_v2  ;;  %v296_v6 = vld [vmem:[%s1210_s5 + $0x60] sm:$0xff]  ;;  %v298_v7 = vld [vmem:[%s1210_s5 + $0x68] sm:$0xff] }
  0x17   : > { %291 = vst [vmem:[%s1215_s6 + $0x18] sm:$0xff] %v290_v3  ;;  %v300_v8 = vld [vmem:[%s1210_s5 + $0x80] sm:$0xff]  ;;  %v302_v9 = vld [vmem:[%s1210_s5 + $0x88] sm:$0xff] }
  0x18   : > { %293 = vst [vmem:[%s1215_s6 + $0x20] sm:$0xff] %v292_v4  ;;  %v304_v10 = vld [vmem:[%s1210_s5 + $0xa0] sm:$0xff]  ;;  %v306_v11 = vld [vmem:[%s1210_s5 + $0xa8] sm:$0xff] }
  0x19   : > { %295 = vst [vmem:[%s1215_s6 + $0x28] sm:$0xff] %v294_v5  ;;  %v308_v12 = vld [vmem:[%s1210_s5 + $0xc0] sm:$0xff]  ;;  %v310_v13 = vld [vmem:[%s1210_s5 + $0xc8] sm:$0xff] }
  0x1a   : > { %297 = vst [vmem:[%s1215_s6 + $0x30] sm:$0xff] %v296_v6  ;;  %v312_v14 = vld [vmem:[%s1210_s5 + $0xe0] sm:$0xff]  ;;  %v314_v15 = vld [vmem:[%s1210_s5 + $0xe8] sm:$0xff] }
  0x1b   : > { %299 = vst [vmem:[%s1215_s6 + $0x38] sm:$0xff] %v298_v7  ;;  %v316_v16 = vld [vmem:[%s1210_s5 + $0x100] sm:$0xff]  ;;  %v318_v17 = vld [vmem:[%s1210_s5 + $0x108] sm:$0xff] }
  0x1c   : > { %301 = vst [vmem:[%s1215_s6 + $0x40] sm:$0xff] %v300_v8  ;;  %v320_v18 = vld [vmem:[%s1210_s5 + $0x120] sm:$0xff]  ;;  %v322_v19 = vld [vmem:[%s1210_s5 + $0x128] sm:$0xff] }
  0x1d   : > { %303 = vst [vmem:[%s1215_s6 + $0x48] sm:$0xff] %v302_v9  ;;  %v324_v20 = vld [vmem:[%s1210_s5 + $0x140] sm:$0xff]  ;;  %v326_v21 = vld [vmem:[%s1210_s5 + $0x148] sm:$0xff] }
  0x1e   : > { %305 = vst [vmem:[%s1215_s6 + $0x50] sm:$0xff] %v304_v10  ;;  %v328_v22 = vld [vmem:[%s1210_s5 + $0x160] sm:$0xff]  ;;  %v330_v23 = vld [vmem:[%s1210_s5 + $0x168] sm:$0xff] }
  0x1f   : > { %307 = vst [vmem:[%s1215_s6 + $0x58] sm:$0xff] %v306_v11  ;;  %v332_v24 = vld [vmem:[%s1210_s5 + $0x180] sm:$0xff]  ;;  %v334_v25 = vld [vmem:[%s1210_s5 + $0x188] sm:$0xff] }
  0x20   : > { %309 = vst [vmem:[%s1215_s6 + $0x60] sm:$0xff] %v308_v12  ;;  %v336_v26 = vld [vmem:[%s1210_s5 + $0x1a0] sm:$0xff]  ;;  %v338_v27 = vld [vmem:[%s1210_s5 + $0x1a8] sm:$0xff] }
  0x21   : > { %311 = vst [vmem:[%s1215_s6 + $0x68] sm:$0xff] %v310_v13  ;;  %v340_v28 = vld [vmem:[%s1210_s5 + $0x1c0] sm:$0xff]  ;;  %v342_v29 = vld [vmem:[%s1210_s5 + $0x1c8] sm:$0xff] }
  0x22   : > { %313 = vst [vmem:[%s1215_s6 + $0x70] sm:$0xff] %v312_v14  ;;  %v344_v30 = vld [vmem:[%s1210_s5 + $0x1e0] sm:$0xff]  ;;  %v346_v31 = vld [vmem:[%s1210_s5 + $0x1e8] sm:$0xff] }
  0x23   : > { %315 = vst [vmem:[%s1215_s6 + $0x78] sm:$0xff] %v314_v15 }
  0x24   : > { %317 = vst [vmem:[%s1215_s6 + $0x80] sm:$0xff] %v316_v16 }
  0x25   : > { %319 = vst [vmem:[%s1215_s6 + $0x88] sm:$0xff] %v318_v17 }
  0x26   : > { %321 = vst [vmem:[%s1215_s6 + $0x90] sm:$0xff] %v320_v18 }
  0x27   : > { %323 = vst [vmem:[%s1215_s6 + $0x98] sm:$0xff] %v322_v19 }
  0x28   : > { %325 = vst [vmem:[%s1215_s6 + $0xa0] sm:$0xff] %v324_v20 }
  0x29   : > { %327 = vst [vmem:[%s1215_s6 + $0xa8] sm:$0xff] %v326_v21 }
  0x2a   : > { %329 = vst [vmem:[%s1215_s6 + $0xb0] sm:$0xff] %v328_v22 }
  0x2b   : > { %331 = vst [vmem:[%s1215_s6 + $0xb8] sm:$0xff] %v330_v23 }
  0x2c   : > { %333 = vst [vmem:[%s1215_s6 + $0xc0] sm:$0xff] %v332_v24 }
  0x2d   : > { %335 = vst [vmem:[%s1215_s6 + $0xc8] sm:$0xff] %v334_v25 }
  0x2e   : > { %337 = vst [vmem:[%s1215_s6 + $0xd0] sm:$0xff] %v336_v26 }
  0x2f   : > { %339 = vst [vmem:[%s1215_s6 + $0xd8] sm:$0xff] %v338_v27 }
  0x30   : > { %341 = vst [vmem:[%s1215_s6 + $0xe0] sm:$0xff] %v340_v28 }
  0x31   : > { %343 = vst [vmem:[%s1215_s6 + $0xe8] sm:$0xff] %v342_v29 }
  0x32   : > { %345 = vst [vmem:[%s1215_s6 + $0xf0] sm:$0xff] %v344_v30 }
  0x33   : > { %347 = vst [vmem:[%s1215_s6 + $0xf8] sm:$0xff] %v346_v31 }
  0x34 PF: > { %p1010_p8 = scmp.ge.s32.totalorder %s1135_s19, 1  ;;  %p352_p9 = scmp.lt.s32.totalorder %s1135_s19, 3 }
  0x36   : > { %p353_p10 = pnand %p1010_p8, %p352_p9 }
  0x37   : > { %s359_s9 = sand.u32 (!%p353_p10), 1, %s1119_s15  }
  0x38   : > { %356 = sbr.rel (%p353_p10) target bundleno = 274 (0x112), region = 70  ;;  %s1284_s10 = sshll.u32 (!%p353_p10), %s359_s9, 8 }
  0x39   : > { %s1287_s11 = scalar_lea.vmem (!%p353_p10), [#allocation2], %s1284_s10  ;;  %s1367_s23 = scalar_lea.vmem (!%p353_p10), [#allocation3], %s1284_s10 }
  0x3d   : > { %v430_v32 = vld [vmem:[%s1642_s2] sm:$0xf]  ;;  %vm532_vm0 = vcmask 1043456   ;;  %vm435_vm1 = vcmask 31744   ;;  %v415_v37 = vld [vmem:[%s1287_s11 + $0x88] sm:$0xff]  ;;  %v416_v41 = vld [vmem:[%s1287_s11 + $0x90] sm:$0xff] }
  0x3e   : > { %1054 = vmatpush.msk.msra.mxu2 %vm532_vm0, %v430_v32  ;;  %1055 = vmatpush.msk.msra.mxu3 %vm532_vm0, %v430_v32  ;;  %v414_v33 = vld [vmem:[%s1287_s11 + $0x80] sm:$0xff]  ;;  %v423_v38 = vld [vmem:[%s1287_s11 + $0xc8] sm:$0xff]  ;;  %v424_v42 = vld [vmem:[%s1287_s11 + $0xd0] sm:$0xff]  ;;  %vm713_vm2 = vcmask 64512   ;;  %s1052_s6 = sshll.u32 (%p1197_p6), %s1127_s17, 4 }
  0x3f   : > { %1013 = vmatpush.msk.msra.mxu0 %vm532_vm0, %v430_v32  ;;  %1053 = vmatpush.msk.msra.mxu1 %vm532_vm0, %v430_v32  ;;  %v422_v34 = vld [vmem:[%s1287_s11 + $0xc0] sm:$0xff]  ;;  %v399_v39 = vld [vmem:[%s1287_s11 + $0x8] sm:$0xff]  ;;  %v400_v43 = vld [vmem:[%s1287_s11 + $0x10] sm:$0xff]  ;;  %s1561_s9 = scalar_lea.vmem (%p1197_p6), %s1644_s4, %s1052_s6 }
  0x40   : > { %v398_v35 = vld [vmem:[%s1287_s11] sm:$0xff]  ;;  %1030 = vmatmul.msk.f32.vlgmr.msra.gmra.mxu2 %vm435_vm1, %v414_v33  ;;  %1038 = vmatmul.msk.f32.vlgmr.msra.gmra.mxu3 %vm435_vm1, %v422_v34  ;;  %v407_v40 = vld [vmem:[%s1287_s11 + $0x48] sm:$0xff]  ;;  %v408_v44 = vld [vmem:[%s1287_s11 + $0x50] sm:$0xff] }
  0x41   : > { %v406_v36 = vld [vmem:[%s1287_s11 + $0x40] sm:$0xff]  ;;  %1014 = vmatmul.msk.f32.vlgmr.msra.gmra.mxu0 %vm435_vm1, %v398_v35  ;;  %v417_v45 = vld [vmem:[%s1287_s11 + $0x98] sm:$0xff]  ;;  %v419_v53 = vld [vmem:[%s1287_s11 + $0xa8] sm:$0xff] }
  0x42   : > { %1022 = vmatmul.msk.f32.vlgmr.msra.gmra.mxu1 %vm435_vm1, %v406_v36  ;;  %v425_v46 = vld [vmem:[%s1287_s11 + $0xd8] sm:$0xff]  ;;  %v418_v49 = vld [vmem:[%s1287_s11 + $0xa0] sm:$0xff]  ;;  %v427_v54 = vld [vmem:[%s1287_s11 + $0xe8] sm:$0xff] }
  0x43   : > { %v401_v47 = vld [vmem:[%s1287_s11 + $0x18] sm:$0xff]  ;;  %v426_v50 = vld [vmem:[%s1287_s11 + $0xe0] sm:$0xff]  ;;  %v403_v55 = vld [vmem:[%s1287_s11 + $0x28] sm:$0xff] }
  0x44   : > { %v409_v48 = vld [vmem:[%s1287_s11 + $0x58] sm:$0xff]  ;;  %v402_v51 = vld [vmem:[%s1287_s11 + $0x20] sm:$0xff]  ;;  %v411_v56 = vld [vmem:[%s1287_s11 + $0x68] sm:$0xff] }
  0x45   : > { %v410_v52 = vld [vmem:[%s1287_s11 + $0x60] sm:$0xff]  ;;  %v420_v57 = vld [vmem:[%s1287_s11 + $0xb0] sm:$0xff]  ;;  %v421_v61 = vld [vmem:[%s1287_s11 + $0xb8] sm:$0xff] }
  0x46   : > { %v428_v58 = vld [vmem:[%s1287_s11 + $0xf0] sm:$0xff]  ;;  %v429_v62 = vld [vmem:[%s1287_s11 + $0xf8] sm:$0xff]  ;;  %v1356_v1 = vld [vmem:[%s1643_s3] ss:$0 sm:$0xff] }
  0x47   : > { %v404_v59 = vld [vmem:[%s1287_s11 + $0x30] sm:$0xff]  ;;  %v405_v63 = vld [vmem:[%s1287_s11 + $0x38] sm:$0xff]  ;;  %v649_v3 = vld [vmem:[%s1640_s0] sm:$0xff] }
  0x48   : > { %1031 = vmatmul.msk.f32.gmra.mxu2 %vm435_vm1, %v415_v37  ;;  %1039 = vmatmul.msk.f32.gmra.mxu3 %vm435_vm1, %v423_v38  ;;  %v412_v60 = vld [vmem:[%s1287_s11 + $0x70] sm:$0xff]  ;;  %v413_v0 = vld [vmem:[%s1287_s11 + $0x78] sm:$0xff]  ;;  %v657_v5 = vld [vmem:[%s1640_s0 + $0x40] sm:$0xff] }
  0x49   : > { %1015 = vmatmul.msk.f32.gmra.mxu0 %vm435_vm1, %v399_v39  ;;  %v665_v11 = vld [vmem:[%s1640_s0 + $0x80] sm:$0xff]  ;;  %v650_v19 = vld [vmem:[%s1640_s0 + $0x8] sm:$0xff]  ;;  %v651_v35 = vld [vmem:[%s1640_s0 + $0x10] sm:$0xff] }
  0x4a   : > { %1023 = vmatmul.msk.f32.gmra.mxu1 %vm435_vm1, %v407_v40  ;;  %v673_v13 = vld [vmem:[%s1640_s0 + $0xc0] sm:$0xff]  ;;  %v658_v21 = vld [vmem:[%s1640_s0 + $0x48] sm:$0xff]  ;;  %v659_v37 = vld [vmem:[%s1640_s0 + $0x50] sm:$0xff] }
  0x4b   : > { %v666_v27 = vld [vmem:[%s1640_s0 + $0x88] sm:$0xff] }
  0x4c   : > { %v674_v29 = vld [vmem:[%s1640_s0 + $0xc8] sm:$0xff] }
  0x50   : > { %1032 = vmatmul.msk.f32.gmra.mxu2 %vm435_vm1, %v416_v41  ;;  %1040 = vmatmul.msk.f32.gmra.mxu3 %vm435_vm1, %v424_v42 }
  0x51   : > { %1016 = vmatmul.msk.f32.gmra.mxu0 %vm435_vm1, %v400_v43  ;;  %v667_v43 = vld [vmem:[%s1640_s0 + $0x90] sm:$0xff] }
  0x52   : > { %1024 = vmatmul.msk.f32.gmra.mxu1 %vm435_vm1, %v408_v44 }
  0x58   : > { %1033 = vmatmul.msk.f32.gmra.mxu2 %vm435_vm1, %v417_v45  ;;  %1041 = vmatmul.msk.f32.gmra.mxu3 %vm435_vm1, %v425_v46  ;;  %v675_v45 = vld [vmem:[%s1640_s0 + $0xd0] sm:$0xff] }
  0x59   : > { %1017 = vmatmul.msk.f32.gmra.mxu0 %vm435_vm1, %v401_v47 }
  0x5a   : > { %1025 = vmatmul.msk.f32.gmra.mxu1 %vm435_vm1, %v409_v48 }
  0x60   : > { %1034 = vmatmul.msk.f32.gmra.mxu2 %vm435_vm1, %v418_v49  ;;  %1042 = vmatmul.msk.f32.gmra.mxu3 %vm435_vm1, %v426_v50 }
  0x61   : > { %1018 = vmatmul.msk.f32.gmra.mxu0 %vm435_vm1, %v402_v51  ;;  %v652_v51 = vld [vmem:[%s1640_s0 + $0x18] sm:$0xff] }
  0x62   : > { %1026 = vmatmul.msk.f32.gmra.mxu1 %vm435_vm1, %v410_v52 }
  0x68   : > { %1035 = vmatmul.msk.f32.gmra.mxu2 %vm435_vm1, %v419_v53  ;;  %1043 = vmatmul.msk.f32.gmra.mxu3 %vm435_vm1, %v427_v54  ;;  %v660_v53 = vld [vmem:[%s1640_s0 + $0x58] sm:$0xff] }
  0x69   : > { %1019 = vmatmul.msk.f32.gmra.mxu0 %vm435_vm1, %v403_v55 }
  0x6a   : > { %1027 = vmatmul.msk.f32.gmra.mxu1 %vm435_vm1, %v411_v56 }
  0x70   : > { %1036 = vmatmul.msk.f32.gmra.mxu2 %vm435_vm1, %v420_v57  ;;  %1044 = vmatmul.msk.f32.gmra.mxu3 %vm435_vm1, %v428_v58 }
  0x71   : > { %1020 = vmatmul.msk.f32.gmra.mxu0 %vm435_vm1, %v404_v59  ;;  %v668_v59 = vld [vmem:[%s1640_s0 + $0x98] sm:$0xff] }
  0x72   : > { %1028 = vmatmul.msk.f32.gmra.mxu1 %vm435_vm1, %v412_v60 }
  0x78   : > { %1037 = vmatmul.msk.f32.gmra.mxu2 %vm435_vm1, %v421_v61  ;;  %1045 = vmatmul.msk.f32.gmra.mxu3 %vm435_vm1, %v429_v62  ;;  %v676_v61 = vld [vmem:[%s1640_s0 + $0xd8] sm:$0xff] }
  0x79   : > { %1021 = vmatmul.msk.f32.gmra.mxu0 %vm435_vm1, %v405_v63 }
  0x7a   : > { %1029 = vmatmul.msk.f32.gmra.mxu1 %vm435_vm1, %v413_v0 }
  0xbe   : > { %v553_v2 = vpop.f32.mrf.mxu0 }
  0xbf   : > { %v577_v4 = vpop.f32.mrf.mxu1  ;;  %v554_v6 = vadd.f32 %v1356_v1, %v553_v2 }
  0xc0   : > { %v578_v7 = vadd.f32 %v1356_v1, %v577_v4  ;;  %v653_v4 = vld [vmem:[%s1640_s0 + $0x20] sm:$0xff] }
  0xc1   : > { %v681_v8 = vadd.f32 %v649_v3, %v554_v6  ;;  %v661_v6 = vld [vmem:[%s1640_s0 + $0x60] sm:$0xff] }
  0xc2   : > { %v689_v9 = vadd.f32 %v657_v5, %v578_v7 }
  0xc3   : > { %714 = vst.msk [vmem:[%s1367_s23] sm:$0xff] %vm713_vm2, %v681_v8  ;;  %v601_v10 = vpop.f32.mrf.mxu2  ;;  %v625_v12 = vpop.f32.mrf.mxu3 }
  0xc4   : > { %722 = vst.msk [vmem:[%s1367_s23 + $0x40] sm:$0xff] %vm713_vm2, %v689_v9  ;;  %v602_v14 = vadd.f32 %v1356_v1, %v601_v10  ;;  %v626_v15 = vadd.f32 %v1356_v1, %v625_v12  ;;  %v669_v12 = vld [vmem:[%s1640_s0 + $0xa0] sm:$0xff] }
  0xc6   : > { %v697_v16 = vadd.f32 %v665_v11, %v602_v14  ;;  %v705_v17 = vadd.f32 %v673_v13, %v626_v15  ;;  %v556_v18 = vpop.f32.mrf.mxu0  ;;  %v677_v14 = vld [vmem:[%s1640_s0 + $0xe0] sm:$0xff] }
  0xc7   : > { %v580_v20 = vpop.f32.mrf.mxu1  ;;  %v557_v22 = vadd.f32 %v1356_v1, %v556_v18 }
  0xc8   : > { %v581_v23 = vadd.f32 %v1356_v1, %v580_v20  ;;  %730 = vst.msk [vmem:[%s1367_s23 + $0x80] sm:$0xff] %vm713_vm2, %v697_v16  ;;  %v654_v20 = vld [vmem:[%s1640_s0 + $0x28] sm:$0xff] }
  0xc9   : > { %738 = vst.msk [vmem:[%s1367_s23 + $0xc0] sm:$0xff] %vm713_vm2, %v705_v17  ;;  %v682_v24 = vadd.f32 %v650_v19, %v557_v22  ;;  %v662_v22 = vld [vmem:[%s1640_s0 + $0x68] sm:$0xff] }
  0xca   : > { %v690_v25 = vadd.f32 %v658_v21, %v581_v23 }
  0xcb   : > { %715 = vst.msk [vmem:[%s1367_s23 + $0x8] sm:$0xff] %vm713_vm2, %v682_v24  ;;  %v604_v26 = vpop.f32.mrf.mxu2  ;;  %v628_v28 = vpop.f32.mrf.mxu3 }
  0xcc   : > { %723 = vst.msk [vmem:[%s1367_s23 + $0x48] sm:$0xff] %vm713_vm2, %v690_v25  ;;  %v605_v30 = vadd.f32 %v1356_v1, %v604_v26  ;;  %v629_v31 = vadd.f32 %v1356_v1, %v628_v28  ;;  %v670_v28 = vld [vmem:[%s1640_s0 + $0xa8] sm:$0xff] }
  0xce   : > { %v698_v32 = vadd.f32 %v666_v27, %v605_v30  ;;  %v706_v33 = vadd.f32 %v674_v29, %v629_v31  ;;  %v559_v34 = vpop.f32.mrf.mxu0  ;;  %v678_v30 = vld [vmem:[%s1640_s0 + $0xe8] sm:$0xff] }
  0xcf   : > { %v583_v36 = vpop.f32.mrf.mxu1  ;;  %v560_v38 = vadd.f32 %v1356_v1, %v559_v34 }
  0xd0   : > { %v584_v39 = vadd.f32 %v1356_v1, %v583_v36  ;;  %731 = vst.msk [vmem:[%s1367_s23 + $0x88] sm:$0xff] %vm713_vm2, %v698_v32  ;;  %v655_v36 = vld [vmem:[%s1640_s0 + $0x30] sm:$0xff] }
  0xd1   : > { %739 = vst.msk [vmem:[%s1367_s23 + $0xc8] sm:$0xff] %vm713_vm2, %v706_v33  ;;  %v683_v40 = vadd.f32 %v651_v35, %v560_v38  ;;  %v663_v38 = vld [vmem:[%s1640_s0 + $0x70] sm:$0xff] }
  0xd2   : > { %v691_v41 = vadd.f32 %v659_v37, %v584_v39 }
  0xd3   : > { %716 = vst.msk [vmem:[%s1367_s23 + $0x10] sm:$0xff] %vm713_vm2, %v683_v40  ;;  %v607_v42 = vpop.f32.mrf.mxu2  ;;  %v631_v44 = vpop.f32.mrf.mxu3 }
  0xd4   : > { %724 = vst.msk [vmem:[%s1367_s23 + $0x50] sm:$0xff] %vm713_vm2, %v691_v41  ;;  %v608_v46 = vadd.f32 %v1356_v1, %v607_v42  ;;  %v632_v47 = vadd.f32 %v1356_v1, %v631_v44  ;;  %v671_v44 = vld [vmem:[%s1640_s0 + $0xb0] sm:$0xff] }
  0xd6   : > { %v699_v48 = vadd.f32 %v667_v43, %v608_v46  ;;  %v707_v49 = vadd.f32 %v675_v45, %v632_v47  ;;  %v562_v50 = vpop.f32.mrf.mxu0  ;;  %v679_v46 = vld [vmem:[%s1640_s0 + $0xf0] sm:$0xff] }
  0xd7   : > { %v586_v52 = vpop.f32.mrf.mxu1  ;;  %v563_v54 = vadd.f32 %v1356_v1, %v562_v50 }
  0xd8   : > { %v587_v55 = vadd.f32 %v1356_v1, %v586_v52  ;;  %732 = vst.msk [vmem:[%s1367_s23 + $0x90] sm:$0xff] %vm713_vm2, %v699_v48  ;;  %v656_v52 = vld [vmem:[%s1640_s0 + $0x38] sm:$0xff] }
  0xd9   : > { %740 = vst.msk [vmem:[%s1367_s23 + $0xd0] sm:$0xff] %vm713_vm2, %v707_v49  ;;  %v684_v56 = vadd.f32 %v652_v51, %v563_v54  ;;  %v664_v54 = vld [vmem:[%s1640_s0 + $0x78] sm:$0xff] }
  0xda   : > { %v692_v57 = vadd.f32 %v660_v53, %v587_v55 }
  0xdb   : > { %717 = vst.msk [vmem:[%s1367_s23 + $0x18] sm:$0xff] %vm713_vm2, %v684_v56  ;;  %v610_v58 = vpop.f32.mrf.mxu2  ;;  %v634_v60 = vpop.f32.mrf.mxu3 }
  0xdc   : > { %725 = vst.msk [vmem:[%s1367_s23 + $0x58] sm:$0xff] %vm713_vm2, %v692_v57  ;;  %v611_v62 = vadd.f32 %v1356_v1, %v610_v58  ;;  %v635_v63 = vadd.f32 %v1356_v1, %v634_v60  ;;  %v672_v60 = vld [vmem:[%s1640_s0 + $0xb8] sm:$0xff] }
  0xde   : > { %v700_v0 = vadd.f32 %v668_v59, %v611_v62  ;;  %v708_v2 = vadd.f32 %v676_v61, %v635_v63  ;;  %v565_v3 = vpop.f32.mrf.mxu0  ;;  %v680_v62 = vld [vmem:[%s1640_s0 + $0xf8] sm:$0xff] }
  0xdf   : > { %v589_v5 = vpop.f32.mrf.mxu1  ;;  %v566_v7 = vadd.f32 %v1356_v1, %v565_v3 }
  0xe0   : > { %v590_v8 = vadd.f32 %v1356_v1, %v589_v5  ;;  %733 = vst.msk [vmem:[%s1367_s23 + $0x98] sm:$0xff] %vm713_vm2, %v700_v0  ;;  %v853_v5 = vld [vmem:[%s1367_s23 + $0x10] sm:$0xff] (%p1197_p6) }
  0xe1   : > { %741 = vst.msk [vmem:[%s1367_s23 + $0xd8] sm:$0xff] %vm713_vm2, %v708_v2  ;;  %v685_v9 = vadd.f32 %v653_v4, %v566_v7  ;;  %v851_v4 = vld [vmem:[%s1367_s23 + $0x8] sm:$0xff] (%p1197_p6) }
  0xe2   : > { %v693_v10 = vadd.f32 %v661_v6, %v590_v8  ;;  %v855_v6 = vld [vmem:[%s1367_s23 + $0x18] sm:$0xff] (%p1197_p6)  ;;  %852 = vst [vmem:[%s1561_s9 + $0x8] sm:$0xff] (%p1197_p6), %v851_v4 }
  0xe3   : > { %718 = vst.msk [vmem:[%s1367_s23 + $0x20] sm:$0xff] %vm713_vm2, %v685_v9  ;;  %v613_v11 = vpop.f32.mrf.mxu2  ;;  %v637_v13 = vpop.f32.mrf.mxu3 }
  0xe4   : > { %726 = vst.msk [vmem:[%s1367_s23 + $0x60] sm:$0xff] %vm713_vm2, %v693_v10  ;;  %v614_v15 = vadd.f32 %v1356_v1, %v613_v11  ;;  %v638_v16 = vadd.f32 %v1356_v1, %v637_v13  ;;  %v865_v11 = vld [vmem:[%s1367_s23 + $0x40] sm:$0xff] (%p1197_p6)  ;;  %v869_v13 = vld [vmem:[%s1367_s23 + $0x50] sm:$0xff] (%p1197_p6) }
  0xe5   : > { %854 = vst [vmem:[%s1561_s9 + $0x20] sm:$0xff] (%p1197_p6), %v853_v5 }
  0xe6   : > { %v701_v17 = vadd.f32 %v669_v12, %v614_v15  ;;  %v709_v18 = vadd.f32 %v677_v14, %v638_v16  ;;  %v568_v19 = vpop.f32.mrf.mxu0  ;;  %856 = vst [vmem:[%s1561_s9 + $0x28] sm:$0xff] (%p1197_p6), %v855_v6  ;;  %v867_v12 = vld [vmem:[%s1367_s23 + $0x48] sm:$0xff] (%p1197_p6)  ;;  %v871_v14 = vld [vmem:[%s1367_s23 + $0x58] sm:$0xff] (%p1197_p6) }
  0xe7   : > { %v592_v21 = vpop.f32.mrf.mxu1  ;;  %v569_v23 = vadd.f32 %v1356_v1, %v568_v19  ;;  %866 = vst [vmem:[%s1561_s9 + $0x80] sm:$0xff] (%p1197_p6), %v865_v11  ;;  %v881_v19 = vld [vmem:[%s1367_s23 + $0x80] sm:$0xff] (%p1197_p6) }
  0xe8   : > { %v593_v24 = vadd.f32 %v1356_v1, %v592_v21  ;;  %734 = vst.msk [vmem:[%s1367_s23 + $0xa0] sm:$0xff] %vm713_vm2, %v701_v17  ;;  %v885_v21 = vld [vmem:[%s1367_s23 + $0x90] sm:$0xff] (%p1197_p6) }
  0xe9   : > { %742 = vst.msk [vmem:[%s1367_s23 + $0xe0] sm:$0xff] %vm713_vm2, %v709_v18  ;;  %v686_v25 = vadd.f32 %v654_v20, %v569_v23  ;;  %v883_v20 = vld [vmem:[%s1367_s23 + $0x88] sm:$0xff] (%p1197_p6) }
  0xea   : > { %v694_v26 = vadd.f32 %v662_v22, %v593_v24  ;;  %v857_v7 = vld [vmem:[%s1367_s23 + $0x20] sm:$0xff] (%p1197_p6)  ;;  %868 = vst [vmem:[%s1561_s9 + $0x88] sm:$0xff] (%p1197_p6), %v867_v12  ;;  %v887_v22 = vld [vmem:[%s1367_s23 + $0x98] sm:$0xff] (%p1197_p6) }
  0xeb   : > { %719 = vst.msk [vmem:[%s1367_s23 + $0x28] sm:$0xff] %vm713_vm2, %v686_v25  ;;  %v616_v27 = vpop.f32.mrf.mxu2  ;;  %v640_v29 = vpop.f32.mrf.mxu3  ;;  %v873_v15 = vld [vmem:[%s1367_s23 + $0x60] sm:$0xff] (%p1197_p6) }
  0xec   : > { %727 = vst.msk [vmem:[%s1367_s23 + $0x68] sm:$0xff] %vm713_vm2, %v694_v26  ;;  %v617_v31 = vadd.f32 %v1356_v1, %v616_v27  ;;  %v641_v32 = vadd.f32 %v1356_v1, %v640_v29  ;;  %v897_v27 = vld [vmem:[%s1367_s23 + $0xc0] sm:$0xff] (%p1197_p6)  ;;  %v901_v29 = vld [vmem:[%s1367_s23 + $0xd0] sm:$0xff] (%p1197_p6) }
  0xed   : > { %858 = vst [vmem:[%s1561_s9 + $0x40] sm:$0xff] (%p1197_p6), %v857_v7 }
  0xee   : > { %v702_v33 = vadd.f32 %v670_v28, %v617_v31  ;;  %v710_v34 = vadd.f32 %v678_v30, %v641_v32  ;;  %v571_v35 = vpop.f32.mrf.mxu0  ;;  %870 = vst [vmem:[%s1561_s9 + $0xa0] sm:$0xff] (%p1197_p6), %v869_v13  ;;  %v899_v28 = vld [vmem:[%s1367_s23 + $0xc8] sm:$0xff] (%p1197_p6)  ;;  %v903_v30 = vld [vmem:[%s1367_s23 + $0xd8] sm:$0xff] (%p1197_p6) }
  0xef   : > { %v595_v37 = vpop.f32.mrf.mxu1  ;;  %v572_v39 = vadd.f32 %v1356_v1, %v571_v35  ;;  %872 = vst [vmem:[%s1561_s9 + $0xa8] sm:$0xff] (%p1197_p6), %v871_v14  ;;  %v889_v23 = vld [vmem:[%s1367_s23 + $0xa0] sm:$0xff] (%p1197_p6) }
  0xf0   : > { %v596_v40 = vadd.f32 %v1356_v1, %v595_v37  ;;  %735 = vst.msk [vmem:[%s1367_s23 + $0xa8] sm:$0xff] %vm713_vm2, %v702_v33  ;;  %v905_v31 = vld [vmem:[%s1367_s23 + $0xe0] sm:$0xff] (%p1197_p6) }
  0xf1   : > { %743 = vst.msk [vmem:[%s1367_s23 + $0xe8] sm:$0xff] %vm713_vm2, %v710_v34  ;;  %v687_v41 = vadd.f32 %v655_v36, %v572_v39 }
  0xf2   : > { %v695_v42 = vadd.f32 %v663_v38, %v596_v40  ;;  %v859_v8 = vld [vmem:[%s1367_s23 + $0x28] sm:$0xff] (%p1197_p6)  ;;  %874 = vst [vmem:[%s1561_s9 + $0xc0] sm:$0xff] (%p1197_p6), %v873_v15 }
  0xf3   : > { %720 = vst.msk [vmem:[%s1367_s23 + $0x30] sm:$0xff] %vm713_vm2, %v687_v41  ;;  %v619_v43 = vpop.f32.mrf.mxu2  ;;  %v643_v45 = vpop.f32.mrf.mxu3  ;;  %v875_v16 = vld [vmem:[%s1367_s23 + $0x68] sm:$0xff] (%p1197_p6) }
  0xf4   : > { %728 = vst.msk [vmem:[%s1367_s23 + $0x70] sm:$0xff] %vm713_vm2, %v695_v42  ;;  %v620_v47 = vadd.f32 %v1356_v1, %v619_v43  ;;  %v644_v48 = vadd.f32 %v1356_v1, %v643_v45 }
  0xf5   : > { %860 = vst [vmem:[%s1561_s9 + $0x48] sm:$0xff] (%p1197_p6), %v859_v8 }
  0xf6   : > { %v703_v49 = vadd.f32 %v671_v44, %v620_v47  ;;  %v711_v50 = vadd.f32 %v679_v46, %v644_v48  ;;  %v574_v51 = vpop.f32.mrf.mxu0  ;;  %876 = vst [vmem:[%s1561_s9 + $0xc8] sm:$0xff] (%p1197_p6), %v875_v16 }
  0xf7   : > { %v598_v53 = vpop.f32.mrf.mxu1  ;;  %v575_v55 = vadd.f32 %v1356_v1, %v574_v51  ;;  %882 = vst [vmem:[%s1561_s9 + $0x100] sm:$0xff] (%p1197_p6), %v881_v19  ;;  %v891_v24 = vld [vmem:[%s1367_s23 + $0xa8] sm:$0xff] (%p1197_p6) }
  0xf8   : > { %v599_v56 = vadd.f32 %v1356_v1, %v598_v53  ;;  %736 = vst.msk [vmem:[%s1367_s23 + $0xb0] sm:$0xff] %vm713_vm2, %v703_v49  ;;  %v907_v32 = vld [vmem:[%s1367_s23 + $0xe8] sm:$0xff] (%p1197_p6) }
  0xf9   : > { %744 = vst.msk [vmem:[%s1367_s23 + $0xf0] sm:$0xff] %vm713_vm2, %v711_v50  ;;  %v688_v57 = vadd.f32 %v656_v52, %v575_v55 }
  0xfa   : > { %v696_v58 = vadd.f32 %v664_v54, %v599_v56  ;;  %v861_v9 = vld [vmem:[%s1367_s23 + $0x30] sm:$0xff] (%p1197_p6)  ;;  %884 = vst [vmem:[%s1561_s9 + $0x108] sm:$0xff] (%p1197_p6), %v883_v20 }
  0xfb   : > { %721 = vst.msk [vmem:[%s1367_s23 + $0x38] sm:$0xff] %vm713_vm2, %v688_v57  ;;  %v622_v59 = vpop.f32.mrf.mxu2  ;;  %v646_v61 = vpop.f32.mrf.mxu3  ;;  %v877_v17 = vld [vmem:[%s1367_s23 + $0x70] sm:$0xff] (%p1197_p6) }
  0xfc   : > { %729 = vst.msk [vmem:[%s1367_s23 + $0x78] sm:$0xff] %vm713_vm2, %v696_v58  ;;  %v623_v63 = vadd.f32 %v1356_v1, %v622_v59  ;;  %v647_v0 = vadd.f32 %v1356_v1, %v646_v61  ;;  %v849_v1 = vld [vmem:[%s1367_s23] sm:$0xff] (%p1197_p6) }
  0xfd   : > { %752 = sbr.rel (!%p1197_p6) target bundleno = 274 (0x112), region = 78  ;;  %850 = vst [vmem:[%s1561_s9] sm:$0xff] (%p1197_p6), %v849_v1 }
  0xfe   : > { %v704_v2 = vadd.f32 %v672_v60, %v623_v63  ;;  %v712_v3 = vadd.f32 %v680_v62, %v647_v0  ;;  %862 = vst [vmem:[%s1561_s9 + $0x60] sm:$0xff] (%p1197_p6), %v861_v9 }
  0xff   : > { %878 = vst [vmem:[%s1561_s9 + $0xe0] sm:$0xff] (%p1197_p6), %v877_v17  ;;  %v893_v25 = vld [vmem:[%s1367_s23 + $0xb0] sm:$0xff] (%p1197_p6) }
 0x100   : > { %737 = vst.msk [vmem:[%s1367_s23 + $0xb8] sm:$0xff] %vm713_vm2, %v704_v2  ;;  %v909_v33 = vld [vmem:[%s1367_s23 + $0xf0] sm:$0xff] (%p1197_p6) }
 0x101   : > { %745 = vst.msk [vmem:[%s1367_s23 + $0xf8] sm:$0xff] %vm713_vm2, %v712_v3 }
 0x102   : > { %v863_v10 = vld [vmem:[%s1367_s23 + $0x38] sm:$0xff]  ;;  %886 = vst [vmem:[%s1561_s9 + $0x120] sm:$0xff] %v885_v21 }
 0x103   : > { %864 = vst [vmem:[%s1561_s9 + $0x68] sm:$0xff] %v863_v10  ;;  %v879_v18 = vld [vmem:[%s1367_s23 + $0x78] sm:$0xff] }
 0x104   : > { %880 = vst [vmem:[%s1561_s9 + $0xe8] sm:$0xff] %v879_v18 }
 0x105   : > { %888 = vst [vmem:[%s1561_s9 + $0x128] sm:$0xff] %v887_v22 }
 0x106   : > { %890 = vst [vmem:[%s1561_s9 + $0x140] sm:$0xff] %v889_v23 }
 0x107   : > { %v895_v26 = vld [vmem:[%s1367_s23 + $0xb8] sm:$0xff]  ;;  %892 = vst [vmem:[%s1561_s9 + $0x148] sm:$0xff] %v891_v24 }
 0x108   : > { %894 = vst [vmem:[%s1561_s9 + $0x160] sm:$0xff] %v893_v25  ;;  %v911_v34 = vld [vmem:[%s1367_s23 + $0xf8] sm:$0xff] }
 0x109   : > { %896 = vst [vmem:[%s1561_s9 + $0x168] sm:$0xff] %v895_v26 }
 0x10a   : > { %898 = vst [vmem:[%s1561_s9 + $0x180] sm:$0xff] %v897_v27 }
 0x10b   : > { %900 = vst [vmem:[%s1561_s9 + $0x188] sm:$0xff] %v899_v28 }
 0x10c   : > { %902 = vst [vmem:[%s1561_s9 + $0x1a0] sm:$0xff] %v901_v29 }
 0x10d   : > { %904 = vst [vmem:[%s1561_s9 + $0x1a8] sm:$0xff] %v903_v30 }
 0x10e   : > { %906 = vst [vmem:[%s1561_s9 + $0x1c0] sm:$0xff] %v905_v31 }
 0x10f   : > { %908 = vst [vmem:[%s1561_s9 + $0x1c8] sm:$0xff] %v907_v32 }
 0x110   : > { %910 = vst [vmem:[%s1561_s9 + $0x1e0] sm:$0xff] %v909_v33 }
 0x111   : > { %912 = vst [vmem:[%s1561_s9 + $0x1e8] sm:$0xff] %v911_v34 }
 0x112 PF: > { %s14_s19 = sadd.s32 1, %s1135_s19   ;;  %s1646_s15 = smov %s1123_s16 }
 0x113   : > { %p11_p11 = scmp.ge.s32.totalorder %s14_s19, 4   ;;  %s1647_s16 = smov %s1202_s25 }
 0x114   : > { %s1648_s17 = smov %s1131_s18  ;;  %s1649_s18 = smov %s1651_s20 }
 0x115   :  { %13 = sbr.rel (!%p11_p11) target bundleno = 3 (0x3), region = 150 }

</bundles_post_ra>
